<compile_context>
chip_gen: v5e
topology: v5e:2x2
jax: 0.10.0
libtpu: 0.0.40
codegen_flags: <defaults>
</compile_context>

<pallas_src>
import jax
import jax.numpy as jnp
from jax.experimental import pallas as pl
from jax.experimental.pallas import tpu as pltpu


def _swish_kernel(x_ref, o_ref):
    x = x_ref[...].astype(jnp.float32)
    # Stable sigmoid: z = exp(-|x|) in (0, 1], never overflows.
    z = jnp.exp(-jnp.abs(x))                 # EUP
    inv = pl.reciprocal(1.0 + z)             # exact 1/(1+z)
    sig = jnp.where(x >= 0, inv, z * inv)    # VPU select/mul (free at mem bound)
    o_ref[...] = (x * sig).astype(o_ref.dtype)


# ~2 MiB of f32 per block: big enough for the mem-bound plateau, small enough
# that double-buffered in+out fits every generation's default scoped VMEM.
_TARGET_BLOCK_ELEMS = 512 * 1024
_LANE_CANDIDATES = (8192, 4096, 2048, 1024, 512, 256, 128)


def _pick_lane(total):
    """Widest lane (multiple of 128) dividing `total`, preferring >= 8 rows."""
    divisors = [c for c in _LANE_CANDIDATES if total % c == 0]
    if not divisors:
        return None
    for c in divisors:
        if total // c >= 8:
            return c
    return divisors[0]


def swish_pallas(x):
    """Elementwise x * sigmoid(x) (== x*exp(x)/(exp(x)+1)) via a Pallas TPU kernel."""
    orig_shape = x.shape
    orig_dtype = x.dtype
    total = x.size

    if total == 0:
        return x

    lane = _pick_lane(total)

    x_flat = jnp.ravel(x)
    pad = 0
    if lane is None:
        # Rare fallback: size not a multiple of 128 -> pad the flat array.
        lane = 128
        padded = pl.cdiv(total, lane) * lane
        pad = padded - total
        x_flat = jnp.pad(x_flat, (0, pad))

    rows = x_flat.size // lane
    x2d = x_flat.reshape(rows, lane)

    # Sublane extent of the block: multiple of 8 (or the full row count).
    if rows <= 8:
        tm = rows
    else:
        tm_target = max(8, (_TARGET_BLOCK_ELEMS // lane) // 8 * 8)
        tm = min((rows // 8) * 8, tm_target)

    grid = (pl.cdiv(rows, tm),)

    out2d = pl.pallas_call(
        _swish_kernel,
        out_shape=jax.ShapeDtypeStruct((rows, lane), orig_dtype),
        grid_spec=pltpu.PrefetchScalarGridSpec(
            num_scalar_prefetch=0,
            grid=grid,
            in_specs=[pl.BlockSpec((tm, lane), lambda i: (i, 0))],
            out_specs=pl.BlockSpec((tm, lane), lambda i: (i, 0)),
        ),
        compiler_params=pltpu.CompilerParams(
            dimension_semantics=("parallel",),
        ),
    )(x2d)

    out_flat = out2d.reshape(-1)
    if pad:
        out_flat = out_flat[:total]
    return out_flat.reshape(orig_shape)


if __name__ == "__main__":
    key = jax.random.PRNGKey(0)
    x = jax.random.normal(key, (2, 4, 16, 16), dtype=jnp.float32)  # NCHW

    out = jax.block_until_ready(swish_pallas(x))

    # Reference checks in plain JAX (original formula is fine at these
    # magnitudes, plus a stable-sigmoid reference).
    ref_orig = x * jnp.exp(x) / (jnp.exp(x) + 1.0)
    ref_stable = x * jax.nn.sigmoid(x)

    assert out.shape == x.shape
    assert out.dtype == x.dtype
    assert jnp.allclose(out, ref_orig, atol=1e-5, rtol=1e-5)
    assert jnp.allclose(out, ref_stable, atol=1e-5, rtol=1e-5)

    print("KERNEL_OK")
</pallas_src>

<mosaic_0001>
module attributes {stable_mosaic.version = 11 : i64} {
  func.func @_swish_kernel(%arg0: i32, %arg1: memref<8x256xf32, #tpu.memory_space<vmem>>, %arg2: memref<8x256xf32, #tpu.memory_space<vmem>>) attributes {dimension_semantics = [#tpu.dimension_semantics<parallel>], iteration_bounds = array<i64: 1>, scalar_prefetch = 0 : i64, scratch_operands = 0 : i64, tpu.core_type = #tpu.core_type<tc>, window_params = [{transform_indices = @transform_0, window_bounds = array<i64: 8, 256>}, {transform_indices = @transform_1, window_bounds = array<i64: 8, 256>}]} {
    %c0 = arith.constant 0 : index
    %c0_0 = arith.constant 0 : index
    %0 = vector.load %arg1[%c0, %c0_0] : memref<8x256xf32, #tpu.memory_space<vmem>>, vector<8x256xf32>
    %1 = math.absf %0 : vector<8x256xf32>
    %cst = arith.constant 0.000000e+00 : f32
    %2 = vector.broadcast %cst : f32 to vector<8x256xf32>
    %3 = arith.subf %2, %1 : vector<8x256xf32>
    %4 = math.exp %3 : vector<8x256xf32>
    %cst_1 = arith.constant 1.000000e+00 : f32
    %5 = vector.broadcast %cst_1 : f32 to vector<8x256xf32>
    %6 = arith.addf %5, %4 : vector<8x256xf32>
    %7 = tpu.reciprocal %6 : vector<8x256xf32> -> vector<8x256xf32>
    %cst_2 = arith.constant 0.000000e+00 : f32
    %8 = vector.broadcast %cst_2 : f32 to vector<8x256xf32>
    %9 = arith.cmpf oge, %0, %8 : vector<8x256xf32>
    %10 = arith.mulf %4, %7 : vector<8x256xf32>
    %11 = arith.select %9, %7, %10 : vector<8x256xi1>, vector<8x256xf32>
    %12 = arith.mulf %0, %11 : vector<8x256xf32>
    %c0_3 = arith.constant 0 : index
    %c0_4 = arith.constant 0 : index
    %13 = vector.load %arg2[%c0_3, %c0_4] : memref<8x256xf32, #tpu.memory_space<vmem>>, vector<8x256xf32>
    tpu.vector_store %arg2[%c0_3, %c0_4], %12 {strides = array<i32>} : memref<8x256xf32, #tpu.memory_space<vmem>>, vector<8x256xf32>,
    return
  }
  func.func @transform_0(%arg0: i32) -> (i32, i32) {
    %c0_i32 = arith.constant 0 : i32
    %c0_i32_0 = arith.constant 0 : i32
    return %arg0, %c0_i32 : i32, i32
  }
  func.func @transform_1(%arg0: i32) -> (i32, i32) {
    %c0_i32 = arith.constant 0 : i32
    %c0_i32_0 = arith.constant 0 : i32
    return %arg0, %c0_i32 : i32, i32
  }
}

</mosaic_0001>

<bundles_post_ra>
// kernel: tpu_custom_call.1
= control target key start
LH: loop header
LB: loop body
LE: loop exit
PB: predicated region body
PF: predicated region fallthrough
CT: control target
= control target key end

     0   :  { %6 = vsyncpa [#allocation3], 0  ;;  %s170_s0 = inlined_call_operand.hbm [shape: f32[8,256], index: 0, kind: input, shape index: {}]   ;;  %s171_s1 = inlined_call_operand.hbm [shape: f32[8,256], index: 1, kind: output, shape index: {}]  }
   0x1   :  { %7 = vsyncpa [#allocation4], 0  ;;  %s13_s8 = sshll.u32 %s170_s0, 4  ;;  %s152_s9 = smov [#allocation2]   ;;  %s14_s8 = int_to_ptr.hbm [resolvable:$true] %s13_s8 }
   0x2   :  { %s15_s10 = sshll.u32 %s152_s9, 4  ;;  %s16_s10 = int_to_ptr.vmem [resolvable:$true] %s15_s10 }
   0x3   :  { %18 = dma.hbm_to_vmem [thread:$0]  %s14_s8, 256, %s16_s10, [#allocation3]  }
   0x4   :  { %148 = dma.done.wait [#allocation3], 256  }
   0x5   :  { %149 = vsyncadd [#allocation3], 4294967040  ;;  %v23_v0 = vld [vmem:[#allocation2] sm:$0xff]  ;;  %v24_v1 = vld [vmem:[#allocation2 + $0x8] sm:$0xff]  ;;  %s153_s0 = smov [#allocation5]   ;;  %s80_s14 = sshll.u32 %s171_s1, 4  ;;  %s81_s14 = int_to_ptr.hbm [resolvable:$true] %s80_s14 }
   0x6   :  { %v25_v2 = vand.u32 2147483647, %v23_v0  ;;  %v26_v3 = vand.u32 2147483647, %v24_v1  ;;  %vm63_vm8 = vcmp.ge.f32.partialorder %v23_v0, 0.0  ;;  %vm64_vm9 = vcmp.ge.f32.partialorder %v24_v1, 0.0 }
   0x7   :  { %s78_s11 = sshll.u32 %s153_s0, 4  ;;  %s79_s11 = int_to_ptr.vmem [resolvable:$true] %s78_s11 }
   0x8   :  { %v27_v4 = vsub.f32 0.0, %v25_v2  ;;  %v28_v5 = vsub.f32 0.0, %v26_v3 }
   0xa   :  { %v29_v6 = vmul.f32 1.442695, %v27_v4  ;;  %v31_v7 = vmul.f32 1.442695, %v28_v5 }
   0xc   :  { %92 = vpow2.f32 %v29_v6 }
   0xd   :  { %94 = vpow2.f32 %v31_v7 }
  0x12   :  { %v93_v8 = vpop.eup %92 }
  0x13   :  { %v95_v9 = vpop.eup %94  ;;  %v33_v10 = vadd.f32 1.0, %v93_v8 }
  0x14   :  { %v34_v11 = vadd.f32 1.0, %v95_v9 }
  0x15   :  { %96 = vrcp.f32 %v33_v10  ;;  %vm40_vm0 = vweird.f32 %v33_v10  ;;  %v46_v15 = vand.u32 2147483648, %v33_v10  ;;  %v44_v18 = vand.u32 2147483647, %v33_v10 }
  0x16   :  { %98 = vrcp.f32 %v34_v11  ;;  %v60_v19 = vand.u32 2147483648, %v34_v11  ;;  %vm54_vm2 = vweird.f32 %v34_v11  ;;  %v58_v21 = vand.u32 2147483647, %v34_v11 }
  0x17   :  { %v47_v23 = vor.u32 1.1754944e-38, %v46_v15  ;;  %vm45_vm5 = vcmp.eq.f32.partialorder %v44_v18, 8.507059e+37 }
  0x18   :  { %v61_v26 = vor.u32 1.1754944e-38, %v60_v19  ;;  %vm59_vm7 = vcmp.eq.f32.partialorder %v58_v21, 8.507059e+37 }
  0x1b   :  { %v97_v12 = vpop.eup %96 }
  0x1c   :  { %v99_v13 = vpop.eup %98  ;;  %v36_v14 = vmul.f32 %v97_v12, %v33_v10  ;;  %vm41_vm1 = vweird.f32 %v97_v12 }
  0x1d   :  { %v50_v16 = vmul.f32 %v99_v13, %v34_v11  ;;  %vm55_vm3 = vweird.f32 %v99_v13  ;;  %vm42_vm4 = vmor %vm40_vm0, %vm41_vm1 }
  0x1e   :  { %v37_v17 = vsub.f32 1.0, %v36_v14  ;;  %vm56_vm6 = vmor %vm54_vm2, %vm55_vm3 }
  0x1f   :  { %v51_v20 = vsub.f32 1.0, %v50_v16 }
  0x20   :  { %v38_v22 = vmul.f32 %v97_v12, %v37_v17 }
  0x21   :  { %v52_v24 = vmul.f32 %v99_v13, %v51_v20 }
  0x22   :  { %v39_v25 = vadd.f32 %v97_v12, %v38_v22 }
  0x23   :  { %v53_v27 = vadd.f32 %v99_v13, %v52_v24 }
  0x24   :  { %v43_v28 = vsel %vm42_vm4, %v97_v12, %v39_v25 }
  0x25   :  { %v48_v29 = vsel %vm45_vm5, %v47_v23, %v43_v28  ;;  %v57_v30 = vsel %vm56_vm6, %v99_v13, %v53_v27 }
  0x26   :  { %v65_v31 = vmul.f32 %v93_v8, %v48_v29  ;;  %v62_v32 = vsel %vm59_vm7, %v61_v26, %v57_v30 }
  0x27   :  { %v66_v33 = vmul.f32 %v95_v9, %v62_v32 }
  0x28   :  { %v67_v34 = vsel %vm63_vm8, %v48_v29, %v65_v31 }
  0x29   :  { %v69_v35 = vmul.f32 %v67_v34, %v23_v0  ;;  %v68_v36 = vsel %vm64_vm9, %v62_v32, %v66_v33 }
  0x2a   :  { %v70_v37 = vmul.f32 %v68_v36, %v24_v1 }
  0x2b   :  { %71 = vst [vmem:[#allocation5] sm:$0xff] %v69_v35 }
  0x2c   :  { %72 = vst [vmem:[#allocation5 + $0x8] sm:$0xff] %v70_v37 }
  0x2d   :  { %83 = dma.vmem_to_hbm [thread:$0]  %s79_s11, 256, %s81_s14, [#allocation4]  }
  0x2e   :  { %150 = dma.done.wait [#allocation4], 256  }
  0x2f   :  { %151 = vsyncadd [#allocation4], 4294967040 }
  0x30   :  { %88 = vsyncpa [#allocation3], 1 }
  0x31   :  { %89 = vsyncpa [#allocation4], 1 }

</bundles_post_ra>
